<compile_context>
chip_gen: v7x
topology: tpu7x:2x2x1
jax: 0.10.0
libtpu: 0.0.40
codegen_flags: <defaults>
</compile_context>

<pallas_src>
import functools

import jax
import jax.numpy as jnp
from jax.experimental import pallas as pl
from jax.experimental.pallas import tpu as pltpu

_LANES = 128
_FOLD_ROWS = 512                        # rows folded per inner accumulation step
_TARGET_BLOCK_BYTES = 2 * 1024 * 1024   # per-input block; x3 inputs x2 buffers
_VMEM_LIMIT_BYTES = 32 * 1024 * 1024    # explicit limit (safe on v5e..v7x)


def _round_up(x, m):
    return -(-x // m) * m


def _hv_loss_kernel(lg_ref, h_ref, v_ref, out_ref, *, tile_rows, fold_rows,
                    rows, tiles_per_part, needs_mask):
    t = pl.program_id(1)

    @pl.when(t == 0)
    def _():
        out_ref[...] = jnp.zeros_like(out_ref)

    gt = pl.program_id(0) * tiles_per_part + t
    n_chunks = tile_rows // fold_rows

    def accumulate(masked):
        # Fold the (tile_rows, 128) tile in fold_rows-row chunks so the
        # squared-diff intermediate stays small (never a full-tile VMEM temp),
        # accumulating into a single (8, 128) f32 slab.
        def body(c, acc):
            r0 = pl.multiple_of(c * fold_rows, fold_rows)
            lg = lg_ref[pl.ds(r0, fold_rows), :].astype(jnp.float32)
            dh = lg - h_ref[pl.ds(r0, fold_rows), :].astype(jnp.float32)
            dv = lg - v_ref[pl.ds(r0, fold_rows), :].astype(jnp.float32)
            sq = dh * dh + dv * dv
            if masked:
                # Zero rows past the true end of the flattened input (partial
                # last tile and/or the phantom step of an uneven 2-way split).
                row_ids = (gt * tile_rows + r0
                           + jax.lax.broadcasted_iota(
                               jnp.int32, (fold_rows, _LANES), 0))
                sq = jnp.where(row_ids < rows, sq, 0.0)
            return acc + sq.reshape(fold_rows // 8, 8, _LANES).sum(axis=0)

        acc = jax.lax.fori_loop(0, n_chunks, body,
                                jnp.zeros((8, _LANES), jnp.float32))
        out_ref[...] += acc

    if needs_mask:
        # Only the genuinely partial / phantom tiles pay for the mask.
        is_partial = (gt + 1) * tile_rows > rows

        @pl.when(jnp.logical_not(is_partial))
        def _():
            accumulate(masked=False)

        @pl.when(is_partial)
        def _():
            accumulate(masked=True)
    else:
        accumulate(masked=False)


def hv_branch_loss(logits, h_grads, v_grads):
    """Pallas equivalent of _HVBranchLoss.forward. Returns a scalar f32."""
    assert logits.shape == h_grads.shape == v_grads.shape
    n = 1
    for d in logits.shape:
        n *= d

    rows = n // _LANES           # full lane-dense rows handled by the kernel
    tail = n - rows * _LANES     # <128 leftover elements (tiny JAX epilogue)

    lg_flat = logits.reshape(-1)
    h_flat = h_grads.reshape(-1)
    v_flat = v_grads.reshape(-1)

    total = jnp.zeros((), jnp.float32)

    if rows > 0:
        itemsizes = [jnp.dtype(a.dtype).itemsize
                     for a in (logits, h_grads, v_grads)]
        sub = max(8, 32 // min(itemsizes))          # sublane multiple per dtype
        max_tile_rows = max(
            sub,
            (_TARGET_BLOCK_BYTES // (_LANES * max(itemsizes)))
            // _FOLD_ROWS * _FOLD_ROWS)             # 4096 f32 / 8192 bf16

        tile_rows = min(max_tile_rows, _round_up(rows, sub))
        fold_rows = min(_FOLD_ROWS, tile_rows)
        tile_rows = _round_up(tile_rows, fold_rows)

        num_tiles = -(-rows // tile_rows)
        # Split tiles over two grid partitions so v7x's 2 TensorCores each
        # stream half the data; harmless sequential loop on v5e/v6e.
        # TODO(synk): confirm on v7x that the "parallel" leading axis shards
        # across both TensorCores (else switch to pltpu.CORE_PARALLEL).
        num_parts = 2 if num_tiles >= 2 else 1
        tiles_per_part = -(-num_tiles // num_parts)
        padded_tiles = num_parts * tiles_per_part
        needs_mask = (rows % tile_rows != 0) or (padded_tiles != num_tiles)

        # Zero-copy view when N % 128 == 0 (common case); for ragged N the
        # prefix slice is one contiguous copy (the <128-elem tail is handled
        # below in plain JAX, no whole-tensor pad).
        lg2 = lg_flat[: rows * _LANES].reshape(rows, _LANES)
        h2 = h_flat[: rows * _LANES].reshape(rows, _LANES)
        v2 = v_flat[: rows * _LANES].reshape(rows, _LANES)

        def in_index(p, t):
            gt = p * tiles_per_part + t
            if padded_tiles != num_tiles:
                # Phantom steps of an uneven split re-read the last real tile;
                # the in-kernel row mask zeroes their contribution.
                gt = jnp.minimum(gt, num_tiles - 1)
            return (gt, 0)

        in_spec = pl.BlockSpec((tile_rows, _LANES), in_index)
        out_spec = pl.BlockSpec((8, _LANES), lambda p, t: (p, 0))

        kernel = functools.partial(
            _hv_loss_kernel, tile_rows=tile_rows, fold_rows=fold_rows,
            rows=rows, tiles_per_part=tiles_per_part, needs_mask=needs_mask)

        partials = pl.pallas_call(
            kernel,
            out_shape=jax.ShapeDtypeStruct((num_parts * 8, _LANES),
                                           jnp.float32),
            grid_spec=pltpu.PrefetchScalarGridSpec(
                num_scalar_prefetch=0,
                grid=(num_parts, tiles_per_part),
                in_specs=[in_spec, in_spec, in_spec],
                out_specs=out_spec,
            ),
            compiler_params=pltpu.CompilerParams(
                dimension_semantics=("parallel", "arbitrary"),
                vmem_limit_bytes=_VMEM_LIMIT_BYTES),
            cost_estimate=pl.CostEstimate(
                flops=6 * n, transcendentals=0,
                bytes_accessed=n * sum(itemsizes) + num_parts * 8 * _LANES * 4),
        )(lg2, h2, v2)

        total = total + jnp.sum(partials)

    if tail:
        # Tiny (<128 elem) ragged tail — plain JAX, negligible cost.
        lt = lg_flat[rows * _LANES:].astype(jnp.float32)
        ht = h_flat[rows * _LANES:].astype(jnp.float32)
        vt = v_flat[rows * _LANES:].astype(jnp.float32)
        total = total + jnp.sum((lt - ht) ** 2 + (lt - vt) ** 2)

    return total * (1.0 / float(n))


def _reference(logits, h_grads, v_grads):
    l = logits.astype(jnp.float32)
    return (jnp.mean((l - h_grads.astype(jnp.float32)) ** 2)
            + jnp.mean((l - v_grads.astype(jnp.float32)) ** 2))


if __name__ == "__main__":
    key = jax.random.PRNGKey(0)
    k1, k2, k3 = jax.random.split(key, 3)

    # Small NCHW shape consistent with an HV-branch head (2 channels: H, V).
    shape = (2, 2, 16, 16)
    logits = jax.random.normal(k1, shape, dtype=jnp.float32)
    h_grads = jax.random.normal(k2, shape, dtype=jnp.float32)
    v_grads = jax.random.normal(k3, shape, dtype=jnp.float32)

    loss = jax.block_until_ready(hv_branch_loss(logits, h_grads, v_grads))
    ref = jax.block_until_ready(_reference(logits, h_grads, v_grads))
    assert jnp.allclose(loss, ref, rtol=1e-5, atol=1e-5), (loss, ref)

    # Ragged / partial-tile path (N % 128 != 0) sanity check.
    shape2 = (1, 2, 7, 13)
    l2 = jax.random.normal(k1, shape2, dtype=jnp.float32)
    h2 = jax.random.normal(k2, shape2, dtype=jnp.float32)
    v2 = jax.random.normal(k3, shape2, dtype=jnp.float32)
    loss2 = jax.block_until_ready(hv_branch_loss(l2, h2, v2))
    ref2 = jax.block_until_ready(_reference(l2, h2, v2))
    assert jnp.allclose(loss2, ref2, rtol=1e-5, atol=1e-5), (loss2, ref2)

    print("KERNEL_OK")
</pallas_src>

<mosaic_0001>
module attributes {stable_mosaic.version = 11 : i64} {
  func.func @_hv_loss_kernel(%arg0: i32, %arg1: i32, %arg2: memref<8x128xf32, #tpu.memory_space<vmem>>, %arg3: memref<8x128xf32, #tpu.memory_space<vmem>>, %arg4: memref<8x128xf32, #tpu.memory_space<vmem>>, %arg5: memref<8x128xf32, #tpu.memory_space<vmem>>) attributes {dimension_semantics = [#tpu.dimension_semantics<parallel>, #tpu.dimension_semantics<arbitrary>], iteration_bounds = array<i64: 1, 1>, scalar_prefetch = 0 : i64, scratch_operands = 0 : i64, tpu.core_type = #tpu.core_type<tc>, window_params = [{transform_indices = @transform_0, window_bounds = array<i64: 8, 128>}, {transform_indices = @transform_1, window_bounds = array<i64: 8, 128>}, {transform_indices = @transform_2, window_bounds = array<i64: 8, 128>}, {transform_indices = @transform_3, window_bounds = array<i64: 8, 128>}]} {
    %c0_i32 = arith.constant 0 : i32
    %0 = arith.cmpi eq, %arg1, %c0_i32 : i32
    %1 = arith.extui %0 : i1 to i32
    %c0_i32_0 = arith.constant 0 : i32
    %2 = arith.cmpi ne, %1, %c0_i32_0 : i32
    scf.if %2 {
      %cst_9 = arith.constant 0.000000e+00 : f32
      %23 = vector.broadcast %cst_9 : f32 to vector<8x128xf32>
      %c0_10 = arith.constant 0 : index
      %c0_11 = arith.constant 0 : index
      %24 = vector.load %arg5[%c0_10, %c0_11] : memref<8x128xf32, #tpu.memory_space<vmem>>, vector<8x128xf32>
      tpu.vector_store %arg5[%c0_10, %c0_11], %23 {strides = array<i32>} : memref<8x128xf32, #tpu.memory_space<vmem>>, vector<8x128xf32>,
    } else {
    }
    %cst = arith.constant 0.000000e+00 : f32
    %3 = vector.broadcast %cst : f32 to vector<8x128xf32>
    %c0_i32_1 = arith.constant 0 : i32
    %c8_i32 = arith.constant 8 : i32
    %4 = arith.muli %c0_i32_1, %c8_i32 : i32
    %5 = tpu.assume_multiple %4, 8 : i32
    %6 = arith.index_cast %5 : i32 to index
    %c0 = arith.constant 0 : index
    %7 = vector.load %arg2[%6, %c0] : memref<8x128xf32, #tpu.memory_space<vmem>>, vector<8x128xf32>
    %8 = arith.index_cast %5 : i32 to index
    %c0_2 = arith.constant 0 : index
    %9 = vector.load %arg3[%8, %c0_2] : memref<8x128xf32, #tpu.memory_space<vmem>>, vector<8x128xf32>
    %10 = arith.subf %7, %9 : vector<8x128xf32>
    %11 = arith.index_cast %5 : i32 to index
    %c0_3 = arith.constant 0 : index
    %12 = vector.load %arg4[%11, %c0_3] : memref<8x128xf32, #tpu.memory_space<vmem>>, vector<8x128xf32>
    %13 = arith.subf %7, %12 : vector<8x128xf32>
    %14 = arith.mulf %10, %10 : vector<8x128xf32>
    %15 = arith.mulf %13, %13 : vector<8x128xf32>
    %16 = arith.addf %14, %15 : vector<8x128xf32>
    %17 = vector.shape_cast %16 : vector<8x128xf32> to vector<1x8x128xf32>
    %cst_4 = arith.constant dense<0.000000e+00> : vector<8x128xf32>
    %18 = vector.multi_reduction <add>, %17, %cst_4 [0] : vector<1x8x128xf32> to vector<8x128xf32>
    %19 = arith.addf %3, %18 : vector<8x128xf32>
    %c1_i32 = arith.constant 1 : i32
    %c0_5 = arith.constant 0 : index
    %c0_6 = arith.constant 0 : index
    %20 = vector.load %arg5[%c0_5, %c0_6] : memref<8x128xf32, #tpu.memory_space<vmem>>, vector<8x128xf32>
    %21 = arith.addf %20, %19 : vector<8x128xf32>
    %c0_7 = arith.constant 0 : index
    %c0_8 = arith.constant 0 : index
    %22 = vector.load %arg5[%c0_7, %c0_8] : memref<8x128xf32, #tpu.memory_space<vmem>>, vector<8x128xf32>
    tpu.vector_store %arg5[%c0_7, %c0_8], %21 {strides = array<i32>} : memref<8x128xf32, #tpu.memory_space<vmem>>, vector<8x128xf32>,
    return
  }
  func.func @transform_0(%arg0: i32, %arg1: i32) -> (i32, i32) {
    %c1_i32 = arith.constant 1 : i32
    %0 = arith.muli %arg0, %c1_i32 : i32
    %1 = arith.addi %0, %arg1 : i32
    %c0_i32 = arith.constant 0 : i32
    %c0_i32_0 = arith.constant 0 : i32
    return %1, %c0_i32 : i32, i32
  }
  func.func @transform_1(%arg0: i32, %arg1: i32) -> (i32, i32) {
    %c1_i32 = arith.constant 1 : i32
    %0 = arith.muli %arg0, %c1_i32 : i32
    %1 = arith.addi %0, %arg1 : i32
    %c0_i32 = arith.constant 0 : i32
    %c0_i32_0 = arith.constant 0 : i32
    return %1, %c0_i32 : i32, i32
  }
  func.func @transform_2(%arg0: i32, %arg1: i32) -> (i32, i32) {
    %c1_i32 = arith.constant 1 : i32
    %0 = arith.muli %arg0, %c1_i32 : i32
    %1 = arith.addi %0, %arg1 : i32
    %c0_i32 = arith.constant 0 : i32
    %c0_i32_0 = arith.constant 0 : i32
    return %1, %c0_i32 : i32, i32
  }
  func.func @transform_3(%arg0: i32, %arg1: i32) -> (i32, i32) {
    %c0_i32 = arith.constant 0 : i32
    %c0_i32_0 = arith.constant 0 : i32
    return %arg0, %c0_i32 : i32, i32
  }
}

</mosaic_0001>

<bundles_post_ra>
// kernel: tpu_custom_call.1
= control target key start
LH: loop header
LB: loop body
LE: loop exit
PB: predicated region body
PF: predicated region fallthrough
CT: control target
= control target key end

     0   :  { %8 = vsyncpa [#allocation3], 0  ;;  %s267_s0 = inlined_call_operand.hbm [shape: f32[8,128], index: 0, kind: input, shape index: {}]   ;;  %s268_s1 = inlined_call_operand.hbm [shape: f32[8,128], index: 1, kind: input, shape index: {}]   ;;  %s269_s2 = inlined_call_operand.hbm [shape: f32[8,128], index: 2, kind: input, shape index: {}]   ;;  %s270_s3 = inlined_call_operand.hbm [shape: f32[8,128], index: 3, kind: output, shape index: {}]  }
   0x1   :  { %9 = vsyncpa [#allocation6], 0 }
   0x2   :  { %10 = vsyncpa [#allocation4], 0  ;;  %s195_s12 = smov [#allocation5]   ;;  %s196_s14 = smov [#allocation2]  }
   0x3   :  { %s33_s13 = sshll.u32 %s195_s12, 4  ;;  %s20_s15 = sshll.u32 %s196_s14, 4  ;;  %s34_s13 = int_to_ptr.vmem [resolvable:$true] %s33_s13  ;;  %s21_s15 = int_to_ptr.vmem [resolvable:$true] %s20_s15 }
   0x4   :  { %s101_s18 = scalar_lea.hbm %s268_s1, 128 }
   0x5   :  { %p102_p0 = scmp.ne.s32.totalorder %s268_s1, %s101_s18  ;;  %p105_p1 = scmp.lt.u32.totalorder %s101_s18, %s268_s1 }
   0x7   :  { %p107_p2 = pnand %p105_p1, %p102_p0 }
   0x9   :  { %110 = shalt.err (!%p107_p2)
}
   0xa   :  { %s111_s23 = scalar_lea.vmem %s34_s13, 128  ;;  %p116_p4 = scmp.lt.s32.totalorder %s34_s13, %s34_s13 }
   0xb   :  { %p112_p3 = scmp.ne.s32.totalorder %s34_s13, %s111_s23  ;;  %p117_p5 = scmp.lt.s32.totalorder %s111_s23, %s111_s23 }
   0xd   :  { %p118_p6 = por %p117_p5, %p116_p4 }
   0xf   :  { %p119_p7 = pnand %p118_p6, %p112_p3 }
  0x11   :  { %122 = shalt.err (!%p119_p7)
}
  0x12   :  { %36 = dma.hbm_to_vmem [thread:$0]  %s268_s1, 128, %s34_s13, [#allocation6]  }
  0x13   :  { %s123_s28 = scalar_lea.hbm %s267_s0, 128 }
  0x14   :  { %p124_p8 = scmp.ne.s32.totalorder %s267_s0, %s123_s28  ;;  %p127_p9 = scmp.lt.u32.totalorder %s123_s28, %s267_s0 }
  0x16   :  { %p129_p10 = pnand %p127_p9, %p124_p8 }
  0x18   :  { %132 = shalt.err (!%p129_p10)
}
  0x19   :  { %s133_s6 = scalar_lea.vmem %s21_s15, 128  ;;  %p138_p12 = scmp.lt.s32.totalorder %s21_s15, %s21_s15 }
  0x1a   :  { %p134_p11 = scmp.ne.s32.totalorder %s21_s15, %s133_s6  ;;  %p139_p13 = scmp.lt.s32.totalorder %s133_s6, %s133_s6 }
  0x1c   :  { %p140_p0 = por %p139_p13, %p138_p12 }
  0x1e   :  { %p141_p1 = pnand %p140_p0, %p134_p11 }
  0x20   :  { %144 = shalt.err (!%p141_p1)
}
  0x21   :  { %23 = dma.hbm_to_vmem [thread:$0]  %s267_s0, 128, %s21_s15, [#allocation3]  }
  0x22   :  { %s197_s8 = smov [#allocation7]   ;;  %s145_s12 = scalar_lea.hbm %s269_s2, 128 }
  0x23   :  { %s46_s9 = sshll.u32 %s197_s8, 4  ;;  %p146_p2 = scmp.ne.s32.totalorder %s269_s2, %s145_s12  ;;  %s47_s9 = int_to_ptr.vmem [resolvable:$true] %s46_s9 }
  0x24   :  { %p149_p3 = scmp.lt.u32.totalorder %s145_s12, %s269_s2 }
  0x26   :  { %p151_p4 = pnand %p149_p3, %p146_p2 }
  0x28   :  { %154 = shalt.err (!%p151_p4)
}
  0x29   :  { %s155_s18 = scalar_lea.vmem %s47_s9, 128  ;;  %p160_p6 = scmp.lt.s32.totalorder %s47_s9, %s47_s9 }
  0x2a   :  { %p156_p5 = scmp.ne.s32.totalorder %s47_s9, %s155_s18  ;;  %p161_p7 = scmp.lt.s32.totalorder %s155_s18, %s155_s18 }
  0x2c   :  { %p162_p8 = por %p161_p7, %p160_p6 }
  0x2e   :  { %p163_p9 = pnand %p162_p8, %p156_p5 }
  0x30   :  { %166 = shalt.err (!%p163_p9)
}
  0x31   :  { %49 = dma.hbm_to_vmem [thread:$0]  %s269_s2, 128, %s47_s9, [#allocation6]  }
  0x32   :  { %189 = dma.done.wait [#allocation3], 128  }
  0x33   :  { %190 = vsyncadd [#allocation3], 4294967168 }
  0x34   :  { %191 = dma.done.wait [#allocation6], 256  }
  0x35   :  { %192 = vsyncadd [#allocation6], 4294967040  ;;  %v67_v0 = vld [vmem:[#allocation2] sm:$0xff]  ;;  %v68_v1 = vld [vmem:[#allocation5] sm:$0xff]  ;;  %s198_s19 = smov [#allocation8]  }
  0x36   :  { %v70_v2 = vld [vmem:[#allocation7] sm:$0xff]  ;;  %v69_v3 = vsub.f32 %v67_v0, %v68_v1  ;;  %s86_s20 = sshll.u32 %s198_s19, 4  ;;  %s87_s20 = int_to_ptr.vmem [resolvable:$true] %s86_s20 }
  0x37   :  { %v71_v4 = vsub.f32 %v67_v0, %v70_v2  ;;  %s167_s21 = scalar_lea.vmem %s87_s20, 128  ;;  %p172_p11 = scmp.lt.s32.totalorder %s87_s20, %s87_s20 }
  0x38   :  { %v72_v5 = vmul.f32 %v69_v3, %v69_v3  ;;  %p168_p10 = scmp.ne.s32.totalorder %s87_s20, %s167_s21  ;;  %p173_p12 = scmp.lt.s32.totalorder %s167_s21, %s167_s21 }
  0x39   :  { %v73_v6 = vmul.f32 %v71_v4, %v71_v4 }
  0x3a   :  { %p174_p13 = por %p173_p12, %p172_p11 }
  0x3b   :  { %v74_v7 = vadd.f32 %v73_v6, %v72_v5 }
  0x3c   :  { %p175_p0 = pnand %p174_p13, %p168_p10 }
  0x3d   :  { %79 = vst [vmem:[#allocation8] sm:$0xff] %v74_v7 }
  0x3e   :  { %178 = shalt.err (!%p175_p0)
}
  0x3f   :  { %s179_s23 = scalar_lea.hbm %s270_s3, 128 }
  0x40   :  { %p180_p1 = scmp.ne.s32.totalorder %s270_s3, %s179_s23  ;;  %p183_p2 = scmp.lt.u32.totalorder %s179_s23, %s270_s3 }
  0x42   :  { %p185_p3 = pnand %p183_p2, %p180_p1 }
  0x44   :  { %188 = shalt.err (!%p185_p3)
}
  0x45   :  { %89 = dma.vmem_to_hbm [thread:$0]  %s87_s20, 128, %s270_s3, [#allocation4]  }
  0x46   :  { %193 = dma.done.wait [#allocation4], 128  }
  0x47   :  { %194 = vsyncadd [#allocation4], 4294967168 }
  0x48   :  { %93 = vsyncpa [#allocation3], 1 }
  0x49   :  { %94 = vsyncpa [#allocation6], 1 }
  0x4a   :  { %95 = vsyncpa [#allocation4], 1 }

</bundles_post_ra>
